<compile_context>
chip_gen: v6e
topology: v6e:2x2x1
jax: 0.10.0
libtpu: 0.0.40
codegen_flags: <defaults>
</compile_context>

<pallas_src>
import math

import jax
import jax.numpy as jnp
from jax.experimental import pallas as pl
from jax.experimental.pallas import tpu as pltpu


def make_positional_encoding(d_model: int, max_len: int = 5000,
                             dtype=jnp.float32) -> jnp.ndarray:
    """Deterministic sinusoidal table, identical math to the PyTorch __init__."""
    assert d_model % 2 == 0, "d_model must be even (same limitation as the PyTorch module)"
    position = jnp.arange(0, max_len, dtype=jnp.float32)[:, None]          # (max_len, 1)
    div_term = jnp.exp(
        jnp.arange(0, d_model, 2, dtype=jnp.float32) * (-math.log(10000.0) / d_model)
    )                                                                       # (d_model/2,)
    angles = position * div_term                                            # (max_len, d_model/2)
    pe = jnp.zeros((max_len, d_model), dtype=jnp.float32)
    pe = pe.at[:, 0::2].set(jnp.sin(angles))
    pe = pe.at[:, 1::2].set(jnp.cos(angles))
    return pe.astype(dtype)                                                 # (max_len, d_model)


def _pe_add_kernel(x_ref, pe_ref, o_ref):
    # x_ref: (tile_b, tile_m, N); pe_ref: (tile_m, N).
    # pe broadcasts over the leading batch-block axis; explicit cast keeps the
    # store dtype-exact for bf16 inputs.
    o_ref[...] = (x_ref[...] + pe_ref[...]).astype(o_ref.dtype)


_TARGET_TILE_BYTES = 4 << 20    # ~4 MiB x-tiles (perf review: raise from 2 MiB)


def _sublane_multiple(dtype) -> int:
    itemsize = jnp.dtype(dtype).itemsize
    return max(8, 32 // itemsize)       # 8 for f32, 16 for bf16, 32 for int8/fp8


def _pick_tile_m(M: int, row_bytes: int, mult: int, target_bytes: int) -> int:
    """Rows per tile when a full (M, N) slab does not fit the tile budget."""
    t = max(1, target_bytes // row_bytes)
    if t >= M:
        return M                        # full axis: always a legal block shape
    t = max(mult, (t // mult) * mult)   # keep second-to-last block dim aligned
    # Prefer an aligned divisor of M in [t/2, t]: avoids a ragged tail tile
    # whose stores are masked and whose DMAs are partially wasted.
    d = t
    lo = max(mult, t // 2)
    while d >= lo:
        if M % d == 0:
            return d
        d -= mult
    return t


def _pick_tiles(B: int, M: int, N: int, dtype,
                target_bytes: int = _TARGET_TILE_BYTES):
    """Returns (tile_b, tile_m) for an x block of (tile_b, tile_m, N)."""
    itemsize = jnp.dtype(dtype).itemsize
    mult = _sublane_multiple(dtype)
    row_bytes = N * itemsize
    slab_bytes = M * row_bytes
    if slab_bytes <= target_bytes:
        # Whole (S, D) slab fits one tile: pack batch elements instead so each
        # grid step still moves a multi-MiB DMA (big win for small S*D).
        tile_m = M
        tile_b = int(max(1, min(B, target_bytes // max(1, slab_bytes))))
        while B % tile_b:               # prefer a divisor of B (no ragged tail)
            tile_b -= 1
        # Keep >= 2 grid steps when there is enough data so both of v7x's
        # TensorCores (parallel grid axes) get a shard.
        if tile_b == B and B > 1 and B * slab_bytes > (2 << 20):
            tile_b = pl.cdiv(B, 2)
            while B % tile_b:
                tile_b -= 1
        return tile_b, tile_m
    return 1, _pick_tile_m(M, row_bytes, mult, target_bytes)


def _add_pe_tiled(x: jnp.ndarray, pe2d: jnp.ndarray,
                  donate_x: bool = False) -> jnp.ndarray:
    """x: (B, M, N); pe2d: (M, N), same dtype.  Returns x + pe2d[None]."""
    B, M, N = x.shape
    itemsize = jnp.dtype(x.dtype).itemsize
    tile_b, tile_m = _pick_tiles(B, M, N, x.dtype)
    num_m = pl.cdiv(M, tile_m)
    num_b = pl.cdiv(B, tile_b)

    # VMEM budget: double-buffered x in + double-buffered out + double-buffered
    # pe tile, plus headroom.  Capped at 48 MiB so it stays legal on v7x
    # (64 MiB physical); floor of 32 MiB clears every default scoped limit.
    x_tile_bytes = tile_b * tile_m * N * itemsize
    pe_tile_bytes = tile_m * N * itemsize
    footprint = 4 * x_tile_bytes + 2 * pe_tile_bytes
    vmem_limit = int(min(48 << 20, max(32 << 20, footprint + (4 << 20))))

    return pl.pallas_call(
        _pe_add_kernel,
        out_shape=jax.ShapeDtypeStruct((B, M, N), x.dtype),
        grid_spec=pltpu.PrefetchScalarGridSpec(
            num_scalar_prefetch=0,
            # m-tiles outer, batch inner: pe's block index is constant across
            # consecutive batch steps, so its re-DMA is skipped.
            grid=(num_m, num_b),
            in_specs=[
                pl.BlockSpec((tile_b, tile_m, N), lambda m, b: (b, m, 0)),
                pl.BlockSpec((tile_m, N), lambda m, b: (m, 0)),
            ],
            out_specs=pl.BlockSpec((tile_b, tile_m, N), lambda m, b: (b, m, 0)),
        ),
        compiler_params=pltpu.CompilerParams(
            dimension_semantics=("parallel", "parallel"),
            vmem_limit_bytes=vmem_limit,
        ),
        input_output_aliases=({0: 0} if donate_x else {}),
    )(x, pe2d)


def positional_encoding_forward(x: jnp.ndarray, pe: jnp.ndarray,
                                donate_x: bool = False) -> jnp.ndarray:
    """x: (B, S, D); pe: (max_len, D). Returns x + pe[:S] broadcast over B."""
    B, S, D = x.shape
    max_len, d_pe = pe.shape
    assert S <= max_len, f"sequence length {S} exceeds max_len {max_len}"
    assert d_pe == D, f"pe d_model {d_pe} != input d_model {D}"

    pe_slice = pe[:S, :].astype(x.dtype)    # == self.pe[:, :x.size(1), :]
    return _add_pe_tiled(x, pe_slice, donate_x=donate_x)


if __name__ == "__main__":
    # Small shapes consistent with the module's forward: (batch, seq, d_model)
    batch, seq, d_model = 2, 8, 32
    max_len = 64

    key = jax.random.PRNGKey(0)
    x = jax.random.normal(key, (batch, seq, d_model), dtype=jnp.float32)
    pe = make_positional_encoding(d_model, max_len)

    # f32 path (exact match against the reference add)
    out = jax.block_until_ready(positional_encoding_forward(x, pe))
    ref = x + pe[None, :seq, :]
    assert out.shape == (batch, seq, d_model)
    assert jnp.allclose(out, ref, atol=1e-6, rtol=1e-6)

    # bf16 path (halves HBM traffic; kernel is bandwidth-bound)
    x_bf16 = x.astype(jnp.bfloat16)
    out_bf16 = jax.block_until_ready(positional_encoding_forward(x_bf16, pe))
    ref_bf16 = x_bf16 + pe[None, :seq, :].astype(jnp.bfloat16)
    assert out_bf16.dtype == jnp.bfloat16
    assert jnp.allclose(out_bf16.astype(jnp.float32),
                        ref_bf16.astype(jnp.float32), atol=1e-2, rtol=1e-2)

    # Batch-packed path (slab fits tile budget -> tile_b > 1, grid (1, num_b))
    xb = jax.random.normal(jax.random.PRNGKey(1), (4, 1024, 512), dtype=jnp.float32)
    peb = make_positional_encoding(512, 1024)
    outb = jax.block_until_ready(positional_encoding_forward(xb, peb))
    assert jnp.allclose(outb, xb + peb[None, :1024, :], atol=1e-6, rtol=1e-6)

    # m-tiled path (slab > tile budget -> tile_m < S, grid (num_m, B))
    xm = jax.random.normal(jax.random.PRNGKey(2), (2, 4096, 512), dtype=jnp.float32)
    pem = make_positional_encoding(512, 4096)
    outm = jax.block_until_ready(positional_encoding_forward(xm, pem))
    assert jnp.allclose(outm, xm + pem[None, :4096, :], atol=1e-6, rtol=1e-6)

    print("KERNEL_OK")
</pallas_src>

<mosaic_0001>
module attributes {stable_mosaic.version = 11 : i64} {
  func.func @_pe_add_kernel(%arg0: i32, %arg1: i32, %arg2: memref<2x8x32xf32, #tpu.memory_space<vmem>>, %arg3: memref<8x32xf32, #tpu.memory_space<vmem>>, %arg4: memref<2x8x32xf32, #tpu.memory_space<vmem>>) attributes {dimension_semantics = [#tpu.dimension_semantics<parallel>, #tpu.dimension_semantics<parallel>], iteration_bounds = array<i64: 1, 1>, scalar_prefetch = 0 : i64, scratch_operands = 0 : i64, tpu.core_type = #tpu.core_type<tc>, window_params = [{transform_indices = @transform_0, window_bounds = array<i64: 2, 8, 32>}, {transform_indices = @transform_1, window_bounds = array<i64: 8, 32>}, {transform_indices = @transform_2, window_bounds = array<i64: 2, 8, 32>}]} {
    %c0 = arith.constant 0 : index
    %c0_0 = arith.constant 0 : index
    %c0_1 = arith.constant 0 : index
    %0 = vector.load %arg2[%c0, %c0_0, %c0_1] : memref<2x8x32xf32, #tpu.memory_space<vmem>>, vector<2x8x32xf32>
    %c0_2 = arith.constant 0 : index
    %c0_3 = arith.constant 0 : index
    %1 = vector.load %arg3[%c0_2, %c0_3] : memref<8x32xf32, #tpu.memory_space<vmem>>, vector<8x32xf32>
    %2 = vector.shape_cast %1 : vector<8x32xf32> to vector<1x8x32xf32>
    %3 = vector.broadcast %2 : vector<1x8x32xf32> to vector<2x8x32xf32>
    %4 = arith.addf %0, %3 : vector<2x8x32xf32>
    %c0_4 = arith.constant 0 : index
    %c0_5 = arith.constant 0 : index
    %c0_6 = arith.constant 0 : index
    %5 = vector.load %arg4[%c0_4, %c0_5, %c0_6] : memref<2x8x32xf32, #tpu.memory_space<vmem>>, vector<2x8x32xf32>
    tpu.vector_store %arg4[%c0_4, %c0_5, %c0_6], %4 {strides = array<i32>} : memref<2x8x32xf32, #tpu.memory_space<vmem>>, vector<2x8x32xf32>,
    return
  }
  func.func @transform_0(%arg0: i32, %arg1: i32) -> (i32, i32, i32) {
    %c0_i32 = arith.constant 0 : i32
    %c0_i32_0 = arith.constant 0 : i32
    return %arg1, %arg0, %c0_i32 : i32, i32, i32
  }
  func.func @transform_1(%arg0: i32, %arg1: i32) -> (i32, i32) {
    %c0_i32 = arith.constant 0 : i32
    %c0_i32_0 = arith.constant 0 : i32
    return %arg0, %c0_i32 : i32, i32
  }
  func.func @transform_2(%arg0: i32, %arg1: i32) -> (i32, i32, i32) {
    %c0_i32 = arith.constant 0 : i32
    %c0_i32_0 = arith.constant 0 : i32
    return %arg1, %arg0, %c0_i32 : i32, i32, i32
  }
}

</mosaic_0001>

<bundles_post_ra>
// kernel: tpu_custom_call.1
= control target key start
LH: loop header
LB: loop body
LE: loop exit
PB: predicated region body
PF: predicated region fallthrough
CT: control target
= control target key end

     0   :  { %7 = vsyncpa [#allocation3], 0  ;;  %s170_s0 = inlined_call_operand.hbm [shape: f32[2,8,32], index: 0, kind: input, shape index: {}]   ;;  %s171_s1 = inlined_call_operand.hbm [shape: f32[8,32], index: 1, kind: input, shape index: {}]   ;;  %s172_s2 = inlined_call_operand.hbm [shape: f32[2,8,32], index: 2, kind: output, shape index: {}]  }
   0x1   :  { %8 = vsyncpa [#allocation6], 0 }
   0x2   :  { %9 = vsyncpa [#allocation4], 0  ;;  %s135_s9 = smov [#allocation2]  }
   0x3   :  { %s15_s10 = sshll.u32 %s135_s9, 4  ;;  %s16_s10 = int_to_ptr.vmem [resolvable:$true] %s15_s10 }
   0x4   :  { %s77_s11 = scalar_lea.vmem %s16_s10, 256  ;;  %p82_p1 = scmp.lt.s32.totalorder %s16_s10, %s16_s10 }
   0x5   :  { %p78_p0 = scmp.ne.s32.totalorder %s16_s10, %s77_s11  ;;  %p83_p2 = scmp.lt.s32.totalorder %s77_s11, %s77_s11 }
   0x7   :  { %p84_p3 = por %p83_p2, %p82_p1 }
   0x9   :  { %p85_p4 = pnand %p84_p3, %p78_p0 }
   0xb   :  { %88 = shalt.err (!%p85_p4)
}
   0xc   :  { %s136_s12 = smov 128   ;;  %s137_s13 = smov 8  }
   0xd   :  { %21 = dma.hbm_to_vmem [thread:$0]  %s170_s0, 256, %s16_s10, [#allocation3], %s136_s12, %s136_s12, %s137_s13  }
   0xe   :  { %s138_s16 = smov [#allocation5]  }
   0xf   :  { %s28_s17 = sshll.u32 %s138_s16, 4  ;;  %s29_s17 = int_to_ptr.vmem [resolvable:$true] %s28_s17 }
  0x10   :  { %s97_s18 = scalar_lea.vmem %s29_s17, 128  ;;  %p102_p6 = scmp.lt.s32.totalorder %s29_s17, %s29_s17 }
  0x11   :  { %p98_p5 = scmp.ne.s32.totalorder %s29_s17, %s97_s18  ;;  %p103_p7 = scmp.lt.s32.totalorder %s97_s18, %s97_s18 }
  0x13   :  { %p104_p8 = por %p103_p7, %p102_p6 }
  0x15   :  { %p105_p9 = pnand %p104_p8, %p98_p5 }
  0x17   :  { %108 = shalt.err (!%p105_p9)
}
  0x18   :  { %31 = dma.hbm_to_vmem [thread:$0]  %s171_s1, 128, %s29_s17, [#allocation6]  }
  0x19   :  { %129 = dma.done.wait [#allocation3], 256  }
  0x1a   :  { %130 = vsyncadd [#allocation3], 4294967040 }
  0x1b   :  { %131 = dma.done.wait [#allocation6], 128  }
  0x1c   :  { %132 = vsyncadd [#allocation6], 4294967168  ;;  %s139_s21 = smov [#allocation7]   ;;  %v38_v0 = vld [vmem:[#allocation2] sm:$0xff]  ;;  %v40_v1 = vld [vmem:[#allocation5] sm:$0xff]  ;;  %vm43_vm0 = vcmask 261120  }
  0x1d   :  { %s51_s0 = sshll.u32 %s139_s21, 4  ;;  %v39_v2 = vld [vmem:[#allocation2 + $0x8] sm:$0xff]  ;;  %v41_v3 = vadd.f32 %v40_v1, %v38_v0  ;;  %s52_s0 = int_to_ptr.vmem [resolvable:$true] %s51_s0 }
  0x1e   :  { %v42_v4 = vadd.f32 %v40_v1, %v39_v2  ;;  %s109_s22 = scalar_lea.vmem %s52_s0, 256  ;;  %p114_p11 = scmp.lt.s32.totalorder %s52_s0, %s52_s0 }
  0x1f   :  { %44 = vst.msk [vmem:[#allocation7] sm:$0xff] %vm43_vm0, %v41_v3  ;;  %p110_p10 = scmp.ne.s32.totalorder %s52_s0, %s109_s22  ;;  %p115_p12 = scmp.lt.s32.totalorder %s109_s22, %s109_s22 }
  0x20   :  { %45 = vst.msk [vmem:[#allocation7 + $0x8] sm:$0xff] %vm43_vm0, %v42_v4 }
  0x21   :  { %p116_p13 = por %p115_p12, %p114_p11 }
  0x23   :  { %p117_p0 = pnand %p116_p13, %p110_p10 }
  0x25   :  { %120 = shalt.err (!%p117_p0)
}
  0x26   :  { %57 = dma.vmem_to_hbm [thread:$0]  %s52_s0, 256, %s172_s2, [#allocation4], %s136_s12, %s136_s12, %s137_s13  }
  0x27   :  { %133 = dma.done.wait [#allocation4], 256  }
  0x28   :  { %134 = vsyncadd [#allocation4], 4294967040 }
  0x29   :  { %61 = vsyncpa [#allocation3], 1 }
  0x2a   :  { %62 = vsyncpa [#allocation6], 1 }
  0x2b   :  { %63 = vsyncpa [#allocation4], 1 }

</bundles_post_ra>
